<compile_context>
chip_gen: v7x
topology: tpu7x:2x2x1
jax: 0.10.0
libtpu: 0.0.40
codegen_flags: <defaults>
</compile_context>

<pallas_src>
import functools
import math

import jax
import jax.numpy as jnp
from jax.experimental import pallas as pl
from jax.experimental.pallas import tpu as pltpu


# ----------------------------------------------------------------------------
# GELU variants
# ----------------------------------------------------------------------------
def _erf_f32(x):
    # Abramowitz & Stegun 7.1.26 rational approximation, |err| <= 1.5e-7.
    # Uses only mul/add/where/exp so it lowers on every Mosaic version.
    ax = jnp.where(x >= 0.0, x, -x)
    t = 1.0 / (1.0 + jnp.float32(0.3275911) * ax)
    poly = ((((jnp.float32(1.061405429) * t + jnp.float32(-1.453152027)) * t
              + jnp.float32(1.421413741)) * t + jnp.float32(-0.284496736)) * t
            + jnp.float32(0.254829592)) * t
    y = 1.0 - poly * jnp.exp(-ax * ax)
    return jnp.where(x >= 0.0, y, -y)


def _gelu_exact(h):
    # Exact (erf-based) GELU, matching torch.nn.GELU() default.
    inv_sqrt2 = jnp.float32(1.0 / math.sqrt(2.0))
    return jnp.float32(0.5) * h * (jnp.float32(1.0) + _erf_f32(h * inv_sqrt2))


def _gelu_tanh(h):
    # tanh-approximate GELU (EUP tanh instead of the erf polynomial on the
    # VALU); ~1e-3 deviation from the exact form.  Preferred on v5e.
    c = jnp.float32(math.sqrt(2.0 / math.pi))
    return jnp.float32(0.5) * h * (
        jnp.float32(1.0) + jnp.tanh(c * (h + jnp.float32(0.044715) * h * h * h)))


# ----------------------------------------------------------------------------
# Kernel
# ----------------------------------------------------------------------------
def _mlp_kernel(x_ref, w1_ref, b1_ref, w2_ref, b2_ref, o_ref, h_ref, *,
                approximate_gelu):
    """Tile (i, j): o[i, j] = gelu(x[i] @ W1 + b1) @ W2[:, j] + b2[j].

    The hidden activation for token tile i is computed once (at j == 0) into
    the VMEM scratch h_ref and reused for every output-feature tile j, so the
    Co axis must stay "arbitrary".
    """
    j = pl.program_id(1)

    @pl.when(j == 0)
    def _():
        h = jnp.dot(x_ref[...], w1_ref[...],
                    preferred_element_type=jnp.float32)           # (tm, H) f32
        h = h + b1_ref[...].astype(jnp.float32)
        h = _gelu_tanh(h) if approximate_gelu else _gelu_exact(h)
        # Keep h in the model dtype so fc2 runs at full MXU rate for bf16.
        h_ref[...] = h.astype(h_ref.dtype)

    o = jnp.dot(h_ref[...], w2_ref[...],
                preferred_element_type=jnp.float32)               # (tm, tn) f32
    o = o + b2_ref[...].astype(jnp.float32)
    o_ref[...] = o.astype(o_ref.dtype)
    # Note: on v7x an optional bf16/fp8 weight carry would halve W1/W2
    # VMEM + HBM traffic for f32 models (not enabled here to preserve
    # reference numerics).


# ----------------------------------------------------------------------------
# Hardware / capability probes
# ----------------------------------------------------------------------------
def _vmem_capacity_bytes():
    try:
        cap = int(getattr(pltpu.get_tpu_info(), "vmem_capacity_bytes", 0))
        if cap > 0:
            return cap
    except Exception:
        pass
    return 64 << 20       # conservative: v7x per-TensorCore VMEM


def _is_v5e():
    try:
        kind = jax.devices()[0].device_kind.lower()
        return ("v5 lite" in kind) or ("v5e" in kind) or ("v5litepod" in kind)
    except Exception:
        return False


_BUFFERED1_OK = None


def _single_buffer_supported():
    """Probe once whether pipeline_mode=pl.Buffered(1) lowers on this build."""
    global _BUFFERED1_OK
    if _BUFFERED1_OK is None:
        try:
            def _copy(x_ref, o_ref):
                o_ref[...] = x_ref[...]

            x = jnp.zeros((8, 128), jnp.float32)
            out = pl.pallas_call(
                _copy,
                out_shape=jax.ShapeDtypeStruct((8, 128), jnp.float32),
                grid=(1,),
                in_specs=[pl.BlockSpec((8, 128), lambda i: (0, 0),
                                       pipeline_mode=pl.Buffered(buffer_count=1))],
                out_specs=pl.BlockSpec((8, 128), lambda i: (0, 0)),
            )(x)
            jax.block_until_ready(out)
            _BUFFERED1_OK = True
        except Exception:
            _BUFFERED1_OK = False
    return _BUFFERED1_OK


# ----------------------------------------------------------------------------
# Tiling policy
# ----------------------------------------------------------------------------
def _cdiv(a, b):
    return -(-a // b)


def _round_up(a, b):
    return _cdiv(a, b) * b


def _vmem_estimate(tm, tn, C, H, itemsize, w2_resident, single_buffer):
    """Resident VMEM bytes, including the f32 MXU-result temporaries."""
    const_copies = 1 if single_buffer else 2
    w1 = const_copies * itemsize * C * H
    b1 = const_copies * itemsize * H
    w2_copies = const_copies if w2_resident else 2
    w2 = w2_copies * itemsize * H * tn
    b2 = w2_copies * itemsize * tn
    x_t = 2 * itemsize * tm * C               # double-buffered input tile
    o_t = 2 * itemsize * tm * tn              # double-buffered output tile
    h_s = itemsize * tm * H                   # hidden-activation scratch
    f32_tmp = 4 * tm * H + 4 * tm * tn        # fc1 dot result + fc2 out temp
    return w1 + b1 + w2 + b2 + x_t + o_t + h_s + f32_tmp + (2 << 20)


def _choose_tiles(M, C, H, Co, itemsize, budget, single_buffer):
    sublane = max(8, 32 // itemsize)          # 8 (f32) / 16 (bf16) / 32 (int8)

    # --- token tile (never exceeds the array along M) -----------------------
    if M <= sublane:
        tm = M                                # block == full dim (always legal)
    else:
        tm_pref = 512 if budget >= (72 << 20) else 256   # v5e/v6e vs v7x
        tm = min(tm_pref, (M // sublane) * sublane)
        # keep >=2 token tiles so both v7x TensorCores get work (cheap elsewhere)
        if _cdiv(M, tm) < 2:
            tm = min(_round_up(_cdiv(M, 2), sublane), (M // sublane) * sublane)

    def fits(tm_, tn_, res_):
        return _vmem_estimate(tm_, tn_, C, H, itemsize, res_,
                              single_buffer) <= budget

    # 1) Prefer keeping all of W2 resident (constant block index => W2 is read
    #    from HBM exactly once).  Shrink tm before giving up on residency.
    tm_res = tm
    while tm_res > sublane and not fits(tm_res, Co, True):
        tm_res = max(_round_up(tm_res // 2, sublane), sublane)
    if fits(tm_res, Co, True):
        return tm_res, Co, True

    # 2) Otherwise stream W2 in lane-dense, 256-aligned column tiles.
    for tn in (1024, 768, 512, 256, 128):
        if tn >= Co:
            continue
        if fits(tm, tn, False):
            return tm, tn, False

    # 3) Last resort: smallest lane-dense tile, shrink tm as needed.
    tn = min(128, Co)
    while tm > sublane and not fits(tm, tn, False):
        tm = max(_round_up(tm // 2, sublane), sublane)
    return tm, tn, tn == Co


# ----------------------------------------------------------------------------
# Wrapper
# ----------------------------------------------------------------------------
def mlp_pallas(x, w1, b1, w2, b2, *, approximate_gelu=None, tn_override=None):
    """Mlp forward: gelu(x @ W1 + b1) @ W2 + b2  (dropout p=0 -> identity).

    x: (..., C); w1: (C, H); b1: (H,); w2: (H, Co); b2: (Co,).
    """
    orig_shape = x.shape
    C = orig_shape[-1]
    H = w1.shape[1]
    Co = w2.shape[1]
    M = int(math.prod(orig_shape[:-1]))
    dtype = x.dtype
    itemsize = jnp.dtype(dtype).itemsize

    if approximate_gelu is None:
        # Exact erf everywhere except v5e (erf polynomial is VALU-heavy there).
        approximate_gelu = _is_v5e()

    capacity = _vmem_capacity_bytes()
    budget = (capacity * 3) // 4              # ~48 MiB v7x, ~96 MiB v5e/v6e
    single_buffer = _single_buffer_supported()

    tm, tn, w2_resident = _choose_tiles(M, C, H, Co, itemsize, budget,
                                        single_buffer)
    if tn_override is not None:               # testing / manual-tuning hook
        tn = min(int(tn_override), Co)
        w2_resident = tn == Co

    grid = (_cdiv(M, tm), _cdiv(Co, tn))

    x2d = x.reshape(M, C)                     # no-copy reshape; no host pads
    b1_2d = b1.reshape(1, H)
    b2_2d = b2.reshape(1, Co)

    def const_spec(shape, index_map):
        # Constant block index: single-buffer when the runtime supports it.
        if single_buffer:
            return pl.BlockSpec(shape, index_map,
                                pipeline_mode=pl.Buffered(buffer_count=1))
        return pl.BlockSpec(shape, index_map)

    w1_spec = const_spec((C, H), lambda i, j: (0, 0))
    b1_spec = const_spec((1, H), lambda i, j: (0, 0))
    if w2_resident:
        w2_spec = const_spec((H, tn), lambda i, j: (0, 0))
        b2_spec = const_spec((1, tn), lambda i, j: (0, 0))
    else:
        w2_spec = pl.BlockSpec((H, tn), lambda i, j: (0, j))
        b2_spec = pl.BlockSpec((1, tn), lambda i, j: (0, j))

    # Advisory cost estimate (counts W2 re-reads when Co is tiled).
    w2_reads = 1 if w2_resident else grid[0]
    flops = 2 * M * C * H + 2 * M * H * Co
    bytes_accessed = itemsize * (M * C + C * H + H + Co + M * Co
                                 + w2_reads * H * Co)
    cost = pl.CostEstimate(flops=flops, transcendentals=M * H,
                           bytes_accessed=bytes_accessed)

    out2d = pl.pallas_call(
        functools.partial(_mlp_kernel, approximate_gelu=approximate_gelu),
        out_shape=jax.ShapeDtypeStruct((M, Co), dtype),
        grid_spec=pltpu.PrefetchScalarGridSpec(
            num_scalar_prefetch=0,
            grid=grid,
            in_specs=[
                pl.BlockSpec((tm, C), lambda i, j: (i, 0)),   # x token tile
                w1_spec,                                      # W1 (constant)
                b1_spec,                                      # b1 (constant)
                w2_spec,                                      # W2
                b2_spec,                                      # b2
            ],
            out_specs=pl.BlockSpec((tm, tn), lambda i, j: (i, j)),
            scratch_shapes=[pltpu.VMEM((tm, H), dtype)],      # hidden act h
        ),
        compiler_params=pltpu.CompilerParams(
            # Token tiles are independent (megacore-shardable); the Co axis
            # reuses the h scratch computed at j == 0 -> must be "arbitrary".
            dimension_semantics=("parallel", "arbitrary"),
            vmem_limit_bytes=int(budget),
        ),
        cost_estimate=cost,
    )(x2d, w1, b1_2d, w2, b2_2d)

    return out2d.reshape(orig_shape[:-1] + (Co,))


# ----------------------------------------------------------------------------
# Reference / init helpers
# ----------------------------------------------------------------------------
def init_mlp_params(key, in_features, hidden_features, out_features,
                    dtype=jnp.float32):
    """Deterministic init mirroring torch.nn.Linear defaults.

    PyTorch stores weight as (out, in); we return the transposed (in, out)
    layout used by the kernel.
    """
    k1, k2, k3, k4 = jax.random.split(key, 4)
    bound1 = 1.0 / math.sqrt(in_features)
    bound2 = 1.0 / math.sqrt(hidden_features)
    w1 = jax.random.uniform(k1, (in_features, hidden_features),
                            minval=-bound1, maxval=bound1, dtype=dtype)
    b1 = jax.random.uniform(k2, (hidden_features,),
                            minval=-bound1, maxval=bound1, dtype=dtype)
    w2 = jax.random.uniform(k3, (hidden_features, out_features),
                            minval=-bound2, maxval=bound2, dtype=dtype)
    b2 = jax.random.uniform(k4, (out_features,),
                            minval=-bound2, maxval=bound2, dtype=dtype)
    return w1, b1, w2, b2


def mlp_reference(x, w1, b1, w2, b2):
    # Full-precision reference (exact erf GELU, f32 matmuls).
    h = jnp.dot(x, w1, precision=jax.lax.Precision.HIGHEST) + b1
    h = 0.5 * h * (1.0 + jax.lax.erf(h / jnp.sqrt(jnp.float32(2.0))))
    return jnp.dot(h, w2, precision=jax.lax.Precision.HIGHEST) + b2


if __name__ == "__main__":
    key = jax.random.PRNGKey(0)
    kx, kp, kx2, kp2 = jax.random.split(key, 4)

    # --- check 1: module defaults (out_features = in_features) --------------
    B, N, C = 2, 8, 16          # batch, sequence, in_features
    H = 32                      # hidden_features
    Co = C                      # out_features
    x = jax.random.normal(kx, (B, N, C), dtype=jnp.float32)
    w1, b1, w2, b2 = init_mlp_params(kp, C, H, Co)

    out = jax.block_until_ready(mlp_pallas(x, w1, b1, w2, b2,
                                           approximate_gelu=False))
    ref = mlp_reference(x, w1, b1, w2, b2)
    assert out.shape == (B, N, Co)
    # 5e-3 tolerance: the in-kernel dot uses the MXU's default f32 path while
    # the reference is forced to HIGHEST precision.
    assert jnp.allclose(out, ref, atol=5e-3, rtol=5e-3), \
        float(jnp.max(jnp.abs(out - ref)))

    # --- check 2: ragged token count + tiled-Co (W2-streaming) path ---------
    B2, N2, C2, H2, Co2 = 2, 7, 16, 32, 256
    x2 = jax.random.normal(kx2, (B2, N2, C2), dtype=jnp.float32)
    p2 = init_mlp_params(kp2, C2, H2, Co2)
    out2 = jax.block_until_ready(mlp_pallas(x2, *p2, approximate_gelu=False,
                                            tn_override=128))
    ref2 = mlp_reference(x2, *p2)
    assert out2.shape == (B2, N2, Co2)
    assert jnp.allclose(out2, ref2, atol=5e-3, rtol=5e-3), \
        float(jnp.max(jnp.abs(out2 - ref2)))

    print("KERNEL_OK")
</pallas_src>

<mosaic_0001>
module attributes {stable_mosaic.version = 11 : i64} {
  func.func @_copy(%arg0: i32, %arg1: memref<8x128xf32, #tpu.memory_space<vmem>>, %arg2: memref<8x128xf32, #tpu.memory_space<vmem>>) attributes {dimension_semantics = [#tpu.dimension_semantics<arbitrary>], iteration_bounds = array<i64: 1>, scalar_prefetch = 0 : i64, scratch_operands = 0 : i64, tpu.core_type = #tpu.core_type<tc>, window_params = [{pipeline_mode = #tpu.pipeline_mode<synchronous>, transform_indices = @transform_0, window_bounds = array<i64: 8, 128>}, {pipeline_mode = #tpu.pipeline_mode<synchronous>, transform_indices = @transform_1, window_bounds = array<i64: 8, 128>}]} {
    %c0 = arith.constant 0 : index
    %c0_0 = arith.constant 0 : index
    %0 = vector.load %arg1[%c0, %c0_0] : memref<8x128xf32, #tpu.memory_space<vmem>>, vector<8x128xf32>
    %c0_1 = arith.constant 0 : index
    %c0_2 = arith.constant 0 : index
    %1 = vector.load %arg2[%c0_1, %c0_2] : memref<8x128xf32, #tpu.memory_space<vmem>>, vector<8x128xf32>
    tpu.vector_store %arg2[%c0_1, %c0_2], %0 {strides = array<i32>} : memref<8x128xf32, #tpu.memory_space<vmem>>, vector<8x128xf32>,
    return
  }
  func.func @transform_0(%arg0: i32) -> (i32, i32) {
    %c0_i32 = arith.constant 0 : i32
    %c0_i32_0 = arith.constant 0 : i32
    %c0_i32_1 = arith.constant 0 : i32
    return %c0_i32, %c0_i32_0 : i32, i32
  }
  func.func @transform_1(%arg0: i32) -> (i32, i32) {
    %c0_i32 = arith.constant 0 : i32
    %c0_i32_0 = arith.constant 0 : i32
    %c0_i32_1 = arith.constant 0 : i32
    return %c0_i32, %c0_i32_0 : i32, i32
  }
}

module attributes {stable_mosaic.version = 11 : i64} {
  func.func @_mlp_kernel(%arg0: i32, %arg1: i32, %arg2: memref<8x16xf32, #tpu.memory_space<vmem>>, %arg3: memref<16x32xf32, #tpu.memory_space<vmem>>, %arg4: memref<1x32xf32, #tpu.memory_space<vmem>>, %arg5: memref<32x16xf32, #tpu.memory_space<vmem>>, %arg6: memref<1x16xf32, #tpu.memory_space<vmem>>, %arg7: memref<8x16xf32, #tpu.memory_space<vmem>>, %arg8: memref<8x32xf32, #tpu.memory_space<vmem>>) attributes {dimension_semantics = [#tpu.dimension_semantics<parallel>, #tpu.dimension_semantics<arbitrary>], iteration_bounds = array<i64: 2, 1>, scalar_prefetch = 0 : i64, scratch_operands = 1 : i64, tpu.core_type = #tpu.core_type<tc>, window_params = [{transform_indices = @transform_0, window_bounds = array<i64: 8, 16>}, {pipeline_mode = #tpu.pipeline_mode<synchronous>, transform_indices = @transform_1, window_bounds = array<i64: 16, 32>}, {pipeline_mode = #tpu.pipeline_mode<synchronous>, transform_indices = @transform_2, window_bounds = array<i64: 1, 32>}, {pipeline_mode = #tpu.pipeline_mode<synchronous>, transform_indices = @transform_3, window_bounds = array<i64: 32, 16>}, {pipeline_mode = #tpu.pipeline_mode<synchronous>, transform_indices = @transform_4, window_bounds = array<i64: 1, 16>}, {transform_indices = @transform_5, window_bounds = array<i64: 8, 16>}]} {
    %c0_i32 = arith.constant 0 : i32
    %0 = arith.cmpi eq, %arg1, %c0_i32 : i32
    %1 = arith.extui %0 : i1 to i32
    %c0_i32_0 = arith.constant 0 : i32
    %2 = arith.cmpi ne, %1, %c0_i32_0 : i32
    scf.if %2 {
      %c0_8 = arith.constant 0 : index
      %c0_9 = arith.constant 0 : index
      %10 = vector.load %arg2[%c0_8, %c0_9] : memref<8x16xf32, #tpu.memory_space<vmem>>, vector<8x16xf32>
      %c0_10 = arith.constant 0 : index
      %c0_11 = arith.constant 0 : index
      %11 = vector.load %arg3[%c0_10, %c0_11] : memref<16x32xf32, #tpu.memory_space<vmem>>, vector<16x32xf32>
      %cst_12 = arith.constant dense<0.000000e+00> : vector<8x32xf32>
      %12 = tpu.matmul %10, %11, %cst_12 {dimension_numbers = #tpu.dot_dimension_numbers<[1], [0], [0], [1], [0, 0, 1, 1], [], []>} : vector<8x16xf32>, vector<16x32xf32>, vector<8x32xf32> -> vector<8x32xf32>
      %c0_13 = arith.constant 0 : index
      %c0_14 = arith.constant 0 : index
      %13 = vector.load %arg4[%c0_13, %c0_14] : memref<1x32xf32, #tpu.memory_space<vmem>>, vector<1x32xf32>
      %14 = vector.broadcast %13 : vector<1x32xf32> to vector<8x32xf32>
      %15 = arith.addf %12, %14 : vector<8x32xf32>
      %cst_15 = arith.constant 5.000000e-01 : f32
      %16 = vector.broadcast %cst_15 : f32 to vector<8x32xf32>
      %17 = arith.mulf %16, %15 : vector<8x32xf32>
      %cst_16 = arith.constant 0.707106769 : f32
      %18 = vector.broadcast %cst_16 : f32 to vector<8x32xf32>
      %19 = arith.mulf %15, %18 : vector<8x32xf32>
      %cst_17 = arith.constant 0.000000e+00 : f32
      %20 = vector.broadcast %cst_17 : f32 to vector<8x32xf32>
      %21 = arith.cmpf oge, %19, %20 : vector<8x32xf32>
      %cst_18 = arith.constant 0.000000e+00 : f32
      %22 = vector.broadcast %cst_18 : f32 to vector<8x32xf32>
      %23 = arith.subf %22, %19 : vector<8x32xf32>
      %24 = arith.select %21, %19, %23 : vector<8x32xi1>, vector<8x32xf32>
      %cst_19 = arith.constant 0.327591091 : f32
      %25 = vector.broadcast %cst_19 : f32 to vector<8x32xf32>
      %26 = arith.mulf %25, %24 : vector<8x32xf32>
      %cst_20 = arith.constant 1.000000e+00 : f32
      %27 = vector.broadcast %cst_20 : f32 to vector<8x32xf32>
      %28 = arith.addf %27, %26 : vector<8x32xf32>
      %cst_21 = arith.constant 1.000000e+00 : f32
      %29 = vector.broadcast %cst_21 : f32 to vector<8x32xf32>
      %30 = arith.divf %29, %28 : vector<8x32xf32>
      %cst_22 = arith.constant 1.06140542 : f32
      %31 = vector.broadcast %cst_22 : f32 to vector<8x32xf32>
      %32 = arith.mulf %31, %30 : vector<8x32xf32>
      %cst_23 = arith.constant -1.45315206 : f32
      %33 = vector.broadcast %cst_23 : f32 to vector<8x32xf32>
      %34 = arith.addf %32, %33 : vector<8x32xf32>
      %35 = arith.mulf %34, %30 : vector<8x32xf32>
      %cst_24 = arith.constant 1.42141378 : f32
      %36 = vector.broadcast %cst_24 : f32 to vector<8x32xf32>
      %37 = arith.addf %35, %36 : vector<8x32xf32>
      %38 = arith.mulf %37, %30 : vector<8x32xf32>
      %cst_25 = arith.constant -0.284496725 : f32
      %39 = vector.broadcast %cst_25 : f32 to vector<8x32xf32>
      %40 = arith.addf %38, %39 : vector<8x32xf32>
      %41 = arith.mulf %40, %30 : vector<8x32xf32>
      %cst_26 = arith.constant 0.254829586 : f32
      %42 = vector.broadcast %cst_26 : f32 to vector<8x32xf32>
      %43 = arith.addf %41, %42 : vector<8x32xf32>
      %44 = arith.mulf %43, %30 : vector<8x32xf32>
      %cst_27 = arith.constant 0.000000e+00 : f32
      %45 = vector.broadcast %cst_27 : f32 to vector<8x32xf32>
      %46 = arith.subf %45, %24 : vector<8x32xf32>
      %47 = arith.mulf %46, %24 : vector<8x32xf32>
      %48 = math.exp %47 : vector<8x32xf32>
      %49 = arith.mulf %44, %48 : vector<8x32xf32>
      %cst_28 = arith.constant 1.000000e+00 : f32
      %50 = vector.broadcast %cst_28 : f32 to vector<8x32xf32>
      %51 = arith.subf %50, %49 : vector<8x32xf32>
      %cst_29 = arith.constant 0.000000e+00 : f32
      %52 = vector.broadcast %cst_29 : f32 to vector<8x32xf32>
      %53 = arith.cmpf oge, %19, %52 : vector<8x32xf32>
      %cst_30 = arith.constant 0.000000e+00 : f32
      %54 = vector.broadcast %cst_30 : f32 to vector<8x32xf32>
      %55 = arith.subf %54, %51 : vector<8x32xf32>
      %56 = arith.select %53, %51, %55 : vector<8x32xi1>, vector<8x32xf32>
      %cst_31 = arith.constant 1.000000e+00 : f32
      %57 = vector.broadcast %cst_31 : f32 to vector<8x32xf32>
      %58 = arith.addf %57, %56 : vector<8x32xf32>
      %59 = arith.mulf %17, %58 : vector<8x32xf32>
      %c0_32 = arith.constant 0 : index
      %c0_33 = arith.constant 0 : index
      %60 = vector.load %arg8[%c0_32, %c0_33] : memref<8x32xf32, #tpu.memory_space<vmem>>, vector<8x32xf32>
      tpu.vector_store %arg8[%c0_32, %c0_33], %59 {strides = array<i32>} : memref<8x32xf32, #tpu.memory_space<vmem>>, vector<8x32xf32>,
    } else {
    }
    %c0 = arith.constant 0 : index
    %c0_1 = arith.constant 0 : index
    %3 = vector.load %arg8[%c0, %c0_1] : memref<8x32xf32, #tpu.memory_space<vmem>>, vector<8x32xf32>
    %c0_2 = arith.constant 0 : index
    %c0_3 = arith.constant 0 : index
    %4 = vector.load %arg5[%c0_2, %c0_3] : memref<32x16xf32, #tpu.memory_space<vmem>>, vector<32x16xf32>
    %cst = arith.constant dense<0.000000e+00> : vector<8x16xf32>
    %5 = tpu.matmul %3, %4, %cst {dimension_numbers = #tpu.dot_dimension_numbers<[1], [0], [0], [1], [0, 0, 1, 1], [], []>} : vector<8x32xf32>, vector<32x16xf32>, vector<8x16xf32> -> vector<8x16xf32>
    %c0_4 = arith.constant 0 : index
    %c0_5 = arith.constant 0 : index
    %6 = vector.load %arg6[%c0_4, %c0_5] : memref<1x16xf32, #tpu.memory_space<vmem>>, vector<1x16xf32>
    %7 = vector.broadcast %6 : vector<1x16xf32> to vector<8x16xf32>
    %8 = arith.addf %5, %7 : vector<8x16xf32>
    %c0_6 = arith.constant 0 : index
    %c0_7 = arith.constant 0 : index
    %9 = vector.load %arg7[%c0_6, %c0_7] : memref<8x16xf32, #tpu.memory_space<vmem>>, vector<8x16xf32>
    tpu.vector_store %arg7[%c0_6, %c0_7], %8 {strides = array<i32>} : memref<8x16xf32, #tpu.memory_space<vmem>>, vector<8x16xf32>,
    return
  }
  func.func @transform_0(%arg0: i32, %arg1: i32) -> (i32, i32) {
    %c0_i32 = arith.constant 0 : i32
    %c0_i32_0 = arith.constant 0 : i32
    return %arg0, %c0_i32 : i32, i32
  }
  func.func @transform_1(%arg0: i32, %arg1: i32) -> (i32, i32) {
    %c0_i32 = arith.constant 0 : i32
    %c0_i32_0 = arith.constant 0 : i32
    %c0_i32_1 = arith.constant 0 : i32
    return %c0_i32, %c0_i32_0 : i32, i32
  }
  func.func @transform_2(%arg0: i32, %arg1: i32) -> (i32, i32) {
    %c0_i32 = arith.constant 0 : i32
    %c0_i32_0 = arith.constant 0 : i32
    %c0_i32_1 = arith.constant 0 : i32
    return %c0_i32, %c0_i32_0 : i32, i32
  }
  func.func @transform_3(%arg0: i32, %arg1: i32) -> (i32, i32) {
    %c0_i32 = arith.constant 0 : i32
    %c0_i32_0 = arith.constant 0 : i32
    %c0_i32_1 = arith.constant 0 : i32
    return %c0_i32, %c0_i32_0 : i32, i32
  }
  func.func @transform_4(%arg0: i32, %arg1: i32) -> (i32, i32) {
    %c0_i32 = arith.constant 0 : i32
    %c0_i32_0 = arith.constant 0 : i32
    %c0_i32_1 = arith.constant 0 : i32
    return %c0_i32, %c0_i32_0 : i32, i32
  }
  func.func @transform_5(%arg0: i32, %arg1: i32) -> (i32, i32) {
    %c0_i32 = arith.constant 0 : i32
    return %arg0, %arg1 : i32, i32
  }
}

</mosaic_0001>

<bundles_post_ra>
// kernel: tpu_custom_call.1
= control target key start
LH: loop header
LB: loop body
LE: loop exit
PB: predicated region body
PF: predicated region fallthrough
CT: control target
= control target key end

     0   :  { %6 = vsyncpa [#allocation3], 0  ;;  %s124_s0 = inlined_call_operand.hbm [shape: f32[8,128], index: 0, kind: input, shape index: {}]   ;;  %s125_s1 = inlined_call_operand.hbm [shape: f32[8,128], index: 1, kind: output, shape index: {}]  }
   0x1   :  { %7 = vsyncpa [#allocation4], 0  ;;  %s88_s6 = smov [#allocation2]   ;;  %s40_s10 = scalar_lea.hbm %s124_s0, 128 }
   0x2   :  { %s14_s7 = sshll.u32 %s88_s6, 4  ;;  %p41_p0 = scmp.ne.s32.totalorder %s124_s0, %s40_s10  ;;  %s15_s7 = int_to_ptr.vmem [resolvable:$true] %s14_s7 }
   0x3   :  { %p44_p1 = scmp.lt.u32.totalorder %s40_s10, %s124_s0 }
   0x5   :  { %p46_p2 = pnand %p44_p1, %p41_p0 }
   0x7   :  { %49 = shalt.err (!%p46_p2)
}
   0x8   :  { %s50_s15 = scalar_lea.vmem %s15_s7, 128  ;;  %p55_p4 = scmp.lt.s32.totalorder %s15_s7, %s15_s7 }
   0x9   :  { %p51_p3 = scmp.ne.s32.totalorder %s15_s7, %s50_s15  ;;  %p56_p5 = scmp.lt.s32.totalorder %s50_s15, %s50_s15 }
   0xb   :  { %p57_p6 = por %p56_p5, %p55_p4 }
   0xd   :  { %p58_p7 = pnand %p57_p6, %p51_p3 }
   0xf   :  { %61 = shalt.err (!%p58_p7)
}
  0x10   :  { %17 = dma.hbm_to_vmem [thread:$0]  %s124_s0, 128, %s15_s7, [#allocation3]  }
  0x11   :  { %84 = dma.done.wait [#allocation3], 128  }
  0x12   :  { %85 = vsyncadd [#allocation3], 4294967168  ;;  %s89_s18 = smov [#allocation5]   ;;  %v21_v0 = vld [vmem:[#allocation2] sm:$0xff] }
  0x13   :  { %s29_s19 = sshll.u32 %s89_s18, 4  ;;  %22 = vst [vmem:[#allocation5] sm:$0xff] %v21_v0  ;;  %s30_s19 = int_to_ptr.vmem [resolvable:$true] %s29_s19 }
  0x14   :  { %s62_s20 = scalar_lea.vmem %s30_s19, 128  ;;  %p67_p9 = scmp.lt.s32.totalorder %s30_s19, %s30_s19 }
  0x15   :  { %p63_p8 = scmp.ne.s32.totalorder %s30_s19, %s62_s20  ;;  %p68_p10 = scmp.lt.s32.totalorder %s62_s20, %s62_s20 }
  0x17   :  { %p69_p11 = por %p68_p10, %p67_p9 }
  0x19   :  { %p70_p12 = pnand %p69_p11, %p63_p8 }
  0x1b   :  { %73 = shalt.err (!%p70_p12)
}
  0x1c   :  { %s74_s23 = scalar_lea.hbm %s125_s1, 128 }
  0x1d   :  { %p75_p13 = scmp.ne.s32.totalorder %s125_s1, %s74_s23  ;;  %p78_p0 = scmp.lt.u32.totalorder %s74_s23, %s125_s1 }
  0x1f   :  { %p80_p1 = pnand %p78_p0, %p75_p13 }
  0x21   :  { %83 = shalt.err (!%p80_p1)
}
  0x22   :  { %32 = dma.vmem_to_hbm [thread:$0]  %s30_s19, 128, %s125_s1, [#allocation4]  }
  0x23   :  { %86 = dma.done.wait [#allocation4], 128  }
  0x24   :  { %87 = vsyncadd [#allocation4], 4294967168 }
  0x25   :  { %36 = vsyncpa [#allocation3], 1 }
  0x26   :  { %37 = vsyncpa [#allocation4], 1 }

// kernel: tpu_custom_call.1
= control target key start
LH: loop header
LB: loop body
LE: loop exit
PB: predicated region body
PF: predicated region fallthrough
CT: control target
= control target key end

     0   :  { %10 = vsyncpa [#allocation4], 0  ;;  %s889_s0 = inlined_call_operand.vmem [shape: f32[16,16], index: 0, kind: input, shape index: {}]   ;;  %s890_s1 = inlined_call_operand.vmem [shape: f32[16,32], index: 1, kind: input, shape index: {}]   ;;  %s891_s2 = inlined_call_operand.vmem [shape: f32[1,32], index: 2, kind: input, shape index: {}]   ;;  %s892_s3 = inlined_call_operand.vmem [shape: f32[32,16], index: 3, kind: input, shape index: {}]   ;;  %s893_s4 = inlined_call_operand.vmem [shape: f32[1,16], index: 4, kind: input, shape index: {}]   ;;  %s894_s5 = inlined_call_operand.hbm [shape: f32[16,16], index: 5, kind: output, shape index: {}]  }
   0x1   :  { %12 = vsyncpa [#allocation4 + $0x1], 0  ;;  %s749_s18 = smov 0   ;;  %s751_s19 = smov 0  }
   0x2   :  { %s753_s20 = smov 0   ;;  %s755_s21 = smov 0  }
   0x3   :  { %s757_s22 = smov 0   ;;  %s759_s23 = smov 0  }
   0x4 LB: > { %s523_s24 = sadd.s32 4294967295, %s713_s23   ;;  %s524_s25 = sadd.s32 4294967294, %s713_s23   ;;  %s713_s23 = sphi %s759_s23, %s18_s23   ;;  %s709_s22 = sphi %s757_s22, %s901_s22   ;;  %s705_s21 = sphi %s755_s21, %s900_s21   ;;  %s701_s20 = sphi %s753_s20, %s899_s20   ;;  %s697_s19 = sphi %s751_s19, %s898_s19   ;;  %s693_s18 = sphi %s749_s18, %s897_s18  }
   0x5   : > { %s30_s26 = sadd.s32 1, %s709_s22  ;;  %s149_s27 = sadd.s32 1, %s701_s20 }
   0x6   : > { %p32_p0 = scmp.ge.s32.totalorder %s30_s26, 2  ;;  %p159_p1 = scmp.ne.s32.totalorder %s701_s20, %s697_s19 }
   0x7   : > { %p160_p2 = scmp.eq.s32.totalorder %s523_s24, 1  ;;  %p165_p3 = scmp.ne.s32.totalorder %s697_s19, %s693_s18 }
   0x8   : > { %s903_s26 = smov (%p32_p0, %s30_s26), 0  ;;  %p166_p5 = scmp.eq.s32.totalorder %s524_s25, 1 }
   0x9   : > { %p789_p4 = por %p160_p2, %p159_p1  ;;  %s144_s29 = ssub.s32 %s709_s22, %s903_s26 }
   0xa   : > { %p527_p6 = scmp.ge.s32.totalorder %s713_s23, 1  ;;  %p147_p7 = scmp.eq.s32.totalorder %s144_s29, 0 }
   0xb   : > { %p796_p8 = por %p166_p5, %p165_p3  ;;  %p203_p9 = scmp.lt.s32.totalorder %s713_s23, 3 }
   0xc   : > { %s802_s6 = scalar_select %p147_p7, %s701_s20, %s149_s27  }
   0xd   : > { %p204_p10 = pnand %p527_p6, %p203_p9 }
   0xe   : > { %v239_v0 = vld [vmem:[%s890_s1] sm:$0xff] (!%p204_p10)  ;;  %v240_v1 = vld [vmem:[%s890_s1 + $0x8] sm:$0xff] (!%p204_p10)  ;;  %p230_p11 = scmp.lt.s32.totalorder (!%p204_p10), %s705_s21, 1  ;;  %v715_v2 = vmov (!%p204_p10), 0.0|0.0   ;;  %vm716_vm0 = vmmov (!%p204_p10), 0   ;;  %v717_v4 = vmov (!%p204_p10), 0.0  }
   0xf   : > { %207 = sbr.rel (%p204_p10) target bundleno = 526 (0x20e), region = 40  ;;  %564 = vmatprep.subr.bf16.mxu0 (!%p204_p10), %v715_v2  ;;  %v565_v3 = vpack.c.bf16 (!%p204_p10), %v240_v1, %v239_v0  ;;  %550 = vmatprep.mubr.msk.f32.mxu0 (!%p204_p10), %vm716_vm0, %v717_v4  ;;  %vm248_vm1 = vcmask (!%p204_p10), 130048   ;;  %v353_v6 = vld [vmem:[%s892_s3] sm:$0xff] (!%p204_p10)  ;;  %v354_v7 = vld [vmem:[%s892_s3 + $0x8] sm:$0xff] (!%p204_p10)  ;;  %v355_v8 = vld [vmem:[%s892_s3 + $0x10] sm:$0xff] (!%p204_p10)  ;;  %vm350_vm3 = vcmask (!%p204_p10), 261120  }
  0x10   : > { %567 = vmatprep.subr.bf16.mxu1 (!%p204_p10), %v715_v2  ;;  %561 = vmatprep.mubr.msk.f32.mxu1 (!%p204_p10), %vm716_vm0, %v717_v4  ;;  %v568_v9 = vpack.c.bf16 (!%p204_p10), %v354_v7, %v353_v6  ;;  %v356_v10 = vld [vmem:[%s892_s3 + $0x18] sm:$0xff] (!%p204_p10)  ;;  %v530_v12 = vld [vmem:[%s891_s2] ss:$0 sm:$0xff] (!%p204_p10) }
  0x11   : > { %566 = vmatpush3.bf16.msra.mxu0 (!%p204_p10), %v565_v3  ;;  %v571_v11 = vpack.c.bf16 (!%p204_p10), %v356_v10, %v355_v8  ;;  %v532_v43 = vld [vmem:[%s893_s4] ss:$0 sm:$0xff] (!%p204_p10) }
  0x12   : > { %569 = vmatpush3.bf16.msra.mxu1 (!%p204_p10), %v568_v9 }
  0x13   : > { %570 = vmatprep.subr.bf16.mxu1 (!%p204_p10), %v715_v2 }
  0x16   : > { %s231_s11 = scalar_select %p230_p11, %s705_s21, 1  ;;  %572 = vmatpush3.bf16.msra.mxu1 %v571_v11 }
  0x18   : > { %s529_s12 = sshll.u32 %s231_s11, 3  ;;  %s227_s11 = sand.u32 1, %s697_s19  }
  0x19   : > { %s233_s15 = scalar_lea.vmem %s889_s0, %s529_s12  ;;  %s528_s12 = sshll.u32 %s227_s11, 3 }
  0x1a   : > { %v238_v5 = vld [vmem:[%s233_s15] sm:$0xff]  ;;  %s535_s15 = sshll.u32 %s705_s21, 7  ;;  %s229_s16 = scalar_lea.vmem [#allocation3], %s528_s12 }
  0x1b   : > { %551 = vmatmul.mubr.msk.f32.vlgmr.msra.gmra.mrb[0].mxu0 %vm248_vm1, %v238_v5  ;;  %s455_s17 = sshll.u32 %s229_s16, 4  ;;  %s841_s27 = scalar_lea.hbm %s894_s5, %s535_s15  ;;  %s843_s17 = int_to_ptr.vmem [resolvable:$true] %s455_s17 }
  0x1c   : > { %s441_s29 = scalar_lea.sflag [#allocation4], %s227_s11  ;;  %s635_s7 = scalar_lea.vmem %s843_s17, 128 }
  0x1d   : > { %p636_p12 = scmp.ne.s32.totalorder %s843_s17, %s635_s7  ;;  %s718_s21 = smov [#allocation3]  }
  0x1e   : > { %s639_s8 = sshll.u32 %s718_s21, 4  ;;  %s640_s8 = int_to_ptr.vmem [resolvable:$false] %s639_s8 }
  0x1f   : > { %p637_p13 = pnand %p636_p12, %p789_p4  ;;  %s641_s9 = scalar_lea.vmem %s640_s8, 256 }
  0x20   : > { %p642_p1 = scmp.lt.s32.totalorder %s843_s17, %s640_s8  ;;  %p643_p2 = scmp.lt.s32.totalorder %s641_s9, %s635_s7 }
  0x21   : > { %p638_p0 = pneg %p637_p13 }
  0x22   : > { %p644_p3 = por %p643_p2, %p642_p1 }
  0x24   : > { %p645_p5 = pnand %p644_p3, %p638_p0 }
  0xee   : > { %v318_v13 = vpop.f32.mrb[0].mxu0 }
  0xef   : > { %v319_v14 = vadd.f32 %v530_v12, %v318_v13  ;;  %v552_v15 = vpop.f32.mrb[1].mxu0 }
  0xf1   : > { %v323_v16 = vmul.f32 0.70710677, %v319_v14  ;;  %v322_v39 = vmul.f32 0.5, %v319_v14 }
  0xf3   : > { %vm324_vm2 = vcmp.ge.f32.partialorder %v323_v16, 0.0  ;;  %v325_v17 = vsub.f32 0.0, %v323_v16 }
  0xf5   : > { %v326_v18 = vsel %vm324_vm2, %v323_v16, %v325_v17 }
  0xf6   : > { %v327_v19 = vmul.f32 0.3275911, %v326_v18  ;;  %v340_v21 = vsub.f32 0.0, %v326_v18 }
  0xf8   : > { %v328_v20 = vadd.f32 1.0, %v327_v19  ;;  %v341_v23 = vmul.f32 %v340_v21, %v326_v18 }
  0xfa   : > { %631 = vrcp.f32 %v328_v20  ;;  %v342_v26 = vmul.f32 1.442695, %v341_v23 }
  0xfc   : > { %633 = vpow2.f32 %v342_v26 }
 0x104   : > { %v632_v22 = vpop.eup %631 }
 0x105   : > { %v331_v24 = vmul.f32 1.0614054, %v632_v22 }
 0x106   : > { %v634_v34 = vpop.eup %633 }
 0x107   : > { %v332_v25 = vadd.f32 -1.4531521, %v331_v24 }
 0x109   : > { %v333_v27 = vmul.f32 %v632_v22, %v332_v25 }
 0x10b   : > { %v334_v28 = vadd.f32 1.4214138, %v333_v27 }
 0x10d   : > { %v335_v29 = vmul.f32 %v632_v22, %v334_v28 }
 0x10f   : > { %v336_v30 = vadd.f32 -0.28449672, %v335_v29 }
 0x111   : > { %v337_v31 = vmul.f32 %v632_v22, %v336_v30 }
 0x113   : > { %v338_v32 = vadd.f32 0.2548296, %v337_v31 }
 0x115   : > { %v339_v33 = vmul.f32 %v632_v22, %v338_v32 }
 0x117   : > { %v344_v35 = vmul.f32 %v634_v34, %v339_v33 }
 0x119   : > { %v345_v36 = vsub.f32 1.0, %v344_v35 }
 0x11b   : > { %v346_v37 = vsub.f32 0.0, %v345_v36 }
 0x11d   : > { %v347_v38 = vsel %vm324_vm2, %v345_v36, %v346_v37 }
 0x11e   : > { %v348_v40 = vadd.f32 1.0, %v347_v38 }
 0x120   : > { %v349_v41 = vmul.f32 %v348_v40, %v322_v39 }
 0x122   : > { %351 = vst.msk [vmem:[#allocation2] sm:$0xff] %vm350_vm3, %v349_v41 }
 0x129   : > { %v352_v42 = vld [vmem:[#allocation2] sm:$0xff] }
 0x12a   : > { %562 = vmatmul.mubr.msk.f32.vlgmr.msra.gmra.mrb[0].mxu1 %vm350_vm3, %v352_v42 }
 0x1fd   : > { %v434_v44 = vpop.f32.mrb[0].mxu1 }
 0x1fe   : > { %v435_v45 = vadd.f32 %v532_v43, %v434_v44  ;;  %v563_v46 = vpop.f32.mrb[1].mxu1 }
 0x200   : > { %439 = vst.msk [vmem:[%s229_s16] sm:$0xff] %vm248_vm1, %v435_v45 }
 0x201   : > { %648 = shalt.err (!%p645_p5)
}
 0x202   : > { %s649_s10 = scalar_lea.hbm %s841_s27, 128  ;;  %s653_s13 = scalar_lea.hbm %s894_s5, 256 }
 0x203   : > { %p650_p6 = scmp.ne.s32.totalorder %s841_s27, %s649_s10  ;;  %p654_p10 = scmp.lt.u32.totalorder %s841_s27, %s894_s5 }
 0x204   : > { %p655_p11 = scmp.lt.u32.totalorder %s653_s13, %s649_s10  ;;  %p657_p13 = scmp.lt.u32.totalorder %s649_s10, %s841_s27 }
 0x205   : > { %p651_p7 = pnand %p650_p6, %p789_p4 }
 0x206   : > { %p656_p12 = por %p655_p11, %p654_p10 }
 0x207   : > { %p652_p9 = pneg %p651_p7 }
 0x208   : > { %p658_p0 = por %p657_p13, %p656_p12 }
 0x20a   : > { %p659_p1 = pnand %p658_p0, %p652_p9 }
 0x20c   : > { %662 = shalt.err (!%p659_p1)
}
 0x20d   : > { %573 = dma.vmem_to_hbm [thread:$0]  (%p789_p4), %s843_s17, 128, %s841_s27, %s441_s29  }
 0x20e PF: > { %p579_p2 = scmp.ge.s32.totalorder %s713_s23, 2  ;;  %s467_s16 = sand.u32 1, %s693_s18  }
 0x20f   : > { %s468_s24 = scalar_lea.sflag [#allocation4], %s467_s16 }
 0x210   : > { %p576_p3 = pnand %p579_p2, %p796_p8 }
 0x212   : > { %688 = dma.done.wait (!%p576_p3), %s468_s24, 128  }
 0x213   : > { %690 = vsyncadd (!%p576_p3), %s468_s24, 4294967168  ;;  %s18_s23 = sadd.s32 1, %s713_s23   ;;  %s897_s18 = smov %s697_s19 }
 0x214   : > { %p15_p5 = scmp.ge.s32.totalorder %s18_s23, 4   ;;  %s898_s19 = smov %s701_s20 }
 0x215   : > { %s899_s20 = smov %s802_s6  ;;  %s900_s21 = smov %s709_s22 }
 0x216   : > { %s901_s22 = smov %s903_s26  ;;  %17 = sbr.rel (!%p15_p5) target bundleno = 4 (0x4), region = 79 }
 0x21d   :  { %473 = vsyncpa [#allocation4], 1 }
 0x21e   :  { %475 = vsyncpa [#allocation4 + $0x1], 1 }

</bundles_post_ra>
